<compile_context>
chip_gen: v5e
topology: v5e:2x2
jax: 0.10.0
libtpu: 0.0.40
codegen_flags: <defaults>
</compile_context>

<pallas_src>
import functools

import jax
import jax.numpy as jnp
from jax.experimental import pallas as pl
from jax.experimental.pallas import tpu as pltpu

EPS = 1e-5  # PyTorch BatchNorm2d default


def _round_up(x, m):
    return (x + m - 1) // m * m


def _make_conv_stats_kernel(shifts, halo, lcols, cin_pack):
    """Pass 1: fused 3x3 conv (single MXU matmul) + per-image BN partial stats."""

    def kernel(x_ref, w_ref, mask_ref, conv_ref, sum_ref, sumsq_ref, patch_ref):
        # Build the 9 im2col taps in VMEM from the halo-padded slab
        # (static lane-offset loads; zero extra HBM traffic).
        for t, s in enumerate(shifts):
            patch_ref[t * cin_pack:(t + 1) * cin_pack, :] = (
                x_ref[0, :, halo + s: halo + s + lcols])

        # Single fused-K matmul on the MXU, f32 accumulation.
        acc = jnp.dot(w_ref[...], patch_ref[...],
                      preferred_element_type=jnp.float32)        # (cot_pack, lcols) f32
        conv_ref[0] = acc

        # BN partial statistics over VALID positions only (mask kills the
        # padding ring and the lane tail). One reduction pass (sum & sum-sq).
        masked = acc * mask_ref[...]
        sum_ref[0] = jnp.sum(masked, axis=1, keepdims=True)
        sumsq_ref[0] = jnp.sum(masked * acc, axis=1, keepdims=True)

    return kernel


def _normalize_kernel(conv_ref, scale_ref, shift_ref, out_ref):
    """Pass 2: y = conv * scale + shift  (single FMA pass, lane-dense stores)."""
    out_ref[0] = conv_ref[0] * scale_ref[...] + shift_ref[...]


@functools.partial(jax.jit, static_argnames=("compute_dtype",))
def rectify_block(x_nchw, w_oihw, gamma, beta, *, compute_dtype=jnp.bfloat16):
    """Conv2d(3x3, pad=1, no bias) -> BatchNorm2d (training batch stats, affine)."""
    N, C_in, H, W = x_nchw.shape
    C_ot = w_oihw.shape[0]
    Hp, Wp = H + 2, W + 2

    cdt = jnp.dtype(compute_dtype)
    assert cdt in (jnp.dtype(jnp.float32), jnp.dtype(jnp.bfloat16))
    sub = 8 * (4 // cdt.itemsize)             # sublane packing: 8 (f32) / 16 (bf16)
    cin_pack = _round_up(C_in, sub)
    cot_pack = _round_up(C_ot, 8)

    halo = Wp + 1                             # largest |tap shift| in flat coords
    lcols = _round_up(Hp * Wp, 128)           # lane-dense output width per image
    ltot = _round_up(2 * halo + lcols, 128)   # input slab width (left/right halo)

    # ---- wrapper glue: pad + flatten each image once (no 9x duplication) ----
    xpad = jnp.pad(x_nchw, ((0, 0), (0, 0), (1, 1), (1, 1)))      # (N, C_in, Hp, Wp)
    xflat = xpad.reshape(N, C_in, Hp * Wp).astype(compute_dtype)
    x_slab = jnp.pad(xflat, ((0, 0), (0, cin_pack - C_in),
                             (halo, ltot - halo - Hp * Wp)))       # (N, cin_pack, ltot)

    # Weights flattened to (cot_pack, 9*cin_pack); tap order t = kh*3 + kw.
    w_pad = jnp.pad(w_oihw.astype(compute_dtype),
                    ((0, cot_pack - C_ot), (0, cin_pack - C_in), (0, 0), (0, 0)))
    w_flat = jnp.transpose(w_pad, (0, 2, 3, 1)).reshape(cot_pack, 9 * cin_pack)

    # Validity mask over the padded/flattened frame: BN stats only over N*H*W.
    idx = jnp.arange(lcols)
    hp, wp = idx // Wp, idx % Wp
    valid = (idx < Hp * Wp) & (hp >= 1) & (hp <= H) & (wp >= 1) & (wp <= W)
    mask = valid.astype(jnp.float32).reshape(1, lcols)

    # Flat-coordinate shift of tap t = kh*3 + kw.
    shifts = tuple((kh - 1) * Wp + (kw - 1) for kh in range(3) for kw in range(3))

    cparams = pltpu.CompilerParams(
        dimension_semantics=("parallel",),          # batch axis -> both TCs on v7x
        vmem_limit_bytes=32 * 1024 * 1024)          # explicit budget (v5e/v6e/v7x safe)

    # ---- pass 1: conv (single fused matmul) + per-image partial BN stats ----
    conv_out, psum, psumsq = pl.pallas_call(
        _make_conv_stats_kernel(shifts, halo, lcols, cin_pack),
        grid=(N,),
        in_specs=[
            pl.BlockSpec((1, cin_pack, ltot), lambda n: (n, 0, 0)),    # streamed image
            pl.BlockSpec((cot_pack, 9 * cin_pack), lambda n: (0, 0)),  # resident weights
            pl.BlockSpec((1, lcols), lambda n: (0, 0)),                # resident mask
        ],
        out_specs=(
            pl.BlockSpec((1, cot_pack, lcols), lambda n: (n, 0, 0)),
            pl.BlockSpec((1, cot_pack, 1), lambda n: (n, 0, 0)),
            pl.BlockSpec((1, cot_pack, 1), lambda n: (n, 0, 0)),
        ),
        out_shape=(
            jax.ShapeDtypeStruct((N, cot_pack, lcols), jnp.float32),
            jax.ShapeDtypeStruct((N, cot_pack, 1), jnp.float32),
            jax.ShapeDtypeStruct((N, cot_pack, 1), jnp.float32),
        ),
        scratch_shapes=[pltpu.VMEM((9 * cin_pack, lcols), compute_dtype)],
        compiler_params=cparams,
    )(x_slab, w_flat, mask)

    # ---- tiny per-channel BN epilogue math in the wrapper (O(C_ot)) ----
    count = jnp.float32(N * H * W)
    s1 = jnp.sum(psum[:, :, 0], axis=0)
    s2 = jnp.sum(psumsq[:, :, 0], axis=0)
    mean = s1 / count
    var = jnp.maximum(s2 / count - mean * mean, 0.0)     # biased batch variance
    inv_std = jax.lax.rsqrt(var + EPS)
    g = jnp.pad(gamma.astype(jnp.float32), (0, cot_pack - C_ot))
    b = jnp.pad(beta.astype(jnp.float32), (0, cot_pack - C_ot))
    scale = (g * inv_std).reshape(cot_pack, 1)
    shift = (b - mean * g * inv_std).reshape(cot_pack, 1)
    # TODO(synk): BatchNorm running_mean/running_var buffer updates (training-time
    # side effect) are not part of the returned tensor and are not modeled here.

    # ---- pass 2: single-FMA normalization (lane-dense, fully parallel) ----
    out_slab = pl.pallas_call(
        _normalize_kernel,
        grid=(N,),
        in_specs=[
            pl.BlockSpec((1, cot_pack, lcols), lambda n: (n, 0, 0)),
            pl.BlockSpec((cot_pack, 1), lambda n: (0, 0)),
            pl.BlockSpec((cot_pack, 1), lambda n: (0, 0)),
        ],
        out_specs=pl.BlockSpec((1, cot_pack, lcols), lambda n: (n, 0, 0)),
        out_shape=jax.ShapeDtypeStruct((N, cot_pack, lcols), jnp.float32),
        compiler_params=cparams,
    )(conv_out, scale, shift)

    # ---- wrapper glue: crop channel padding + padding ring back to NCHW ----
    out = out_slab[:, :C_ot, :Hp * Wp].reshape(N, C_ot, Hp, Wp)
    return out[:, :, 1:1 + H, 1:1 + W]


def _reference(x_nchw, w_oihw, gamma, beta):
    conv = jax.lax.conv_general_dilated(
        x_nchw.astype(jnp.float32), w_oihw.astype(jnp.float32),
        window_strides=(1, 1), padding="SAME",
        dimension_numbers=("NCHW", "OIHW", "NCHW"))
    mu = conv.mean(axis=(0, 2, 3), keepdims=True)
    var = conv.var(axis=(0, 2, 3), keepdims=True)   # biased, like BN training mode
    return ((conv - mu) / jnp.sqrt(var + EPS)
            * gamma.reshape(1, -1, 1, 1) + beta.reshape(1, -1, 1, 1))


if __name__ == "__main__":
    key = jax.random.PRNGKey(0)
    k_x, k_w, k_g, k_b = jax.random.split(key, 4)

    N, C_in, C_ot, H, W = 2, 4, 8, 16, 16
    x = jax.random.normal(k_x, (N, C_in, H, W), jnp.float32)
    w = 0.1 * jax.random.normal(k_w, (C_ot, C_in, 3, 3), jnp.float32)  # Conv2d OIHW
    gamma = 1.0 + 0.1 * jax.random.normal(k_g, (C_ot,), jnp.float32)   # BN weight
    beta = 0.1 * jax.random.normal(k_b, (C_ot,), jnp.float32)          # BN bias

    ref = _reference(x, w, gamma, beta)

    # f32 compute path: faithful to the PyTorch module's numerics.
    out_f32 = rectify_block(x, w, gamma, beta, compute_dtype=jnp.float32)
    jax.block_until_ready(out_f32)
    assert out_f32.shape == (N, C_ot, H, W)
    assert jnp.allclose(out_f32, ref, atol=1e-4, rtol=1e-4), "f32 mismatch vs reference"

    # bf16 matmul-operand path (perf default for v6e/v7x): f32 accumulation and
    # f32 BN statistics; tolerance reflects bf16 operand rounding.
    out_bf16 = rectify_block(x, w, gamma, beta, compute_dtype=jnp.bfloat16)
    jax.block_until_ready(out_bf16)
    assert out_bf16.shape == (N, C_ot, H, W)
    assert jnp.allclose(out_bf16, ref, atol=2e-2, rtol=2e-2), "bf16 mismatch vs reference"

    print("KERNEL_OK")
</pallas_src>

<mosaic_0001>
module attributes {stable_mosaic.version = 11 : i64} {
  func.func @_normalize_kernel(%arg0: i32, %arg1: memref<1x8x384xf32, #tpu.memory_space<vmem>>, %arg2: memref<8x1xf32, #tpu.memory_space<vmem>>, %arg3: memref<8x1xf32, #tpu.memory_space<vmem>>, %arg4: memref<1x8x384xf32, #tpu.memory_space<vmem>>) attributes {dimension_semantics = [#tpu.dimension_semantics<parallel>], iteration_bounds = array<i64: 2>, scalar_prefetch = 0 : i64, scratch_operands = 0 : i64, tpu.core_type = #tpu.core_type<tc>, window_params = [{transform_indices = @transform_0, window_bounds = array<i64: 1, 8, 384>}, {pipeline_mode = #tpu.pipeline_mode<synchronous>, transform_indices = @transform_1, window_bounds = array<i64: 8, 1>}, {pipeline_mode = #tpu.pipeline_mode<synchronous>, transform_indices = @transform_2, window_bounds = array<i64: 8, 1>}, {transform_indices = @transform_3, window_bounds = array<i64: 1, 8, 384>}]} {
    %c0 = arith.constant 0 : index
    %c0_0 = arith.constant 0 : index
    %c0_1 = arith.constant 0 : index
    %0 = vector.load %arg1[%c0, %c0_0, %c0_1] : memref<1x8x384xf32, #tpu.memory_space<vmem>>, vector<1x8x384xf32>
    %1 = vector.shape_cast %0 : vector<1x8x384xf32> to vector<8x384xf32>
    %c0_2 = arith.constant 0 : index
    %c0_3 = arith.constant 0 : index
    %2 = vector.load %arg2[%c0_2, %c0_3] : memref<8x1xf32, #tpu.memory_space<vmem>>, vector<8x1xf32>
    %3 = vector.broadcast %2 : vector<8x1xf32> to vector<8x384xf32>
    %4 = arith.mulf %1, %3 : vector<8x384xf32>
    %c0_4 = arith.constant 0 : index
    %c0_5 = arith.constant 0 : index
    %5 = vector.load %arg3[%c0_4, %c0_5] : memref<8x1xf32, #tpu.memory_space<vmem>>, vector<8x1xf32>
    %6 = vector.broadcast %5 : vector<8x1xf32> to vector<8x384xf32>
    %7 = arith.addf %4, %6 : vector<8x384xf32>
    %c0_6 = arith.constant 0 : index
    %c0_7 = arith.constant 0 : index
    %c0_8 = arith.constant 0 : index
    %8 = vector.load %arg4[%c0_6, %c0_7, %c0_8] : memref<1x8x384xf32, #tpu.memory_space<vmem>>, vector<1x8x384xf32>
    %9 = vector.shape_cast %8 : vector<1x8x384xf32> to vector<8x384xf32>
    %10 = vector.shape_cast %7 : vector<8x384xf32> to vector<1x8x384xf32>
    tpu.vector_store %arg4[%c0_6, %c0_7, %c0_8], %10 {strides = array<i32>} : memref<1x8x384xf32, #tpu.memory_space<vmem>>, vector<1x8x384xf32>,
    return
  }
  func.func @transform_0(%arg0: i32) -> (i32, i32, i32) {
    %c0_i32 = arith.constant 0 : i32
    %c0_i32_0 = arith.constant 0 : i32
    %c0_i32_1 = arith.constant 0 : i32
    return %arg0, %c0_i32, %c0_i32_0 : i32, i32, i32
  }
  func.func @transform_1(%arg0: i32) -> (i32, i32) {
    %c0_i32 = arith.constant 0 : i32
    %c0_i32_0 = arith.constant 0 : i32
    %c0_i32_1 = arith.constant 0 : i32
    return %c0_i32, %c0_i32_0 : i32, i32
  }
  func.func @transform_2(%arg0: i32) -> (i32, i32) {
    %c0_i32 = arith.constant 0 : i32
    %c0_i32_0 = arith.constant 0 : i32
    %c0_i32_1 = arith.constant 0 : i32
    return %c0_i32, %c0_i32_0 : i32, i32
  }
  func.func @transform_3(%arg0: i32) -> (i32, i32, i32) {
    %c0_i32 = arith.constant 0 : i32
    %c0_i32_0 = arith.constant 0 : i32
    %c0_i32_1 = arith.constant 0 : i32
    return %arg0, %c0_i32, %c0_i32_0 : i32, i32, i32
  }
}

module attributes {stable_mosaic.version = 11 : i64} {
  func.func @kernel(%arg0: i32, %arg1: memref<1x8x512xf32, #tpu.memory_space<vmem>>, %arg2: memref<8x72xf32, #tpu.memory_space<vmem>>, %arg3: memref<1x384xf32, #tpu.memory_space<vmem>>, %arg4: memref<1x8x384xf32, #tpu.memory_space<vmem>>, %arg5: memref<1x8x1xf32, #tpu.memory_space<vmem>>, %arg6: memref<1x8x1xf32, #tpu.memory_space<vmem>>, %arg7: memref<72x384xf32, #tpu.memory_space<vmem>>) attributes {dimension_semantics = [#tpu.dimension_semantics<parallel>], iteration_bounds = array<i64: 2>, scalar_prefetch = 0 : i64, scratch_operands = 1 : i64, tpu.core_type = #tpu.core_type<tc>, window_params = [{transform_indices = @transform_0, window_bounds = array<i64: 1, 8, 512>}, {pipeline_mode = #tpu.pipeline_mode<synchronous>, transform_indices = @transform_1, window_bounds = array<i64: 8, 72>}, {pipeline_mode = #tpu.pipeline_mode<synchronous>, transform_indices = @transform_2, window_bounds = array<i64: 1, 384>}, {transform_indices = @transform_3, window_bounds = array<i64: 1, 8, 384>}, {transform_indices = @transform_4, window_bounds = array<i64: 1, 8, 1>}, {transform_indices = @transform_5, window_bounds = array<i64: 1, 8, 1>}]} {
    %c0 = arith.constant 0 : index
    %c0_0 = arith.constant 0 : index
    %c0_1 = arith.constant 0 : index
    %0 = vector.load %arg1[%c0, %c0_0, %c0_1] : memref<1x8x512xf32, #tpu.memory_space<vmem>>, vector<1x8x384xf32>
    %1 = vector.shape_cast %0 : vector<1x8x384xf32> to vector<8x384xf32>
    %c0_2 = arith.constant 0 : index
    %c0_3 = arith.constant 0 : index
    %2 = vector.load %arg7[%c0_2, %c0_3] : memref<72x384xf32, #tpu.memory_space<vmem>>, vector<8x384xf32>
    tpu.vector_store %arg7[%c0_2, %c0_3], %1 {strides = array<i32>} : memref<72x384xf32, #tpu.memory_space<vmem>>, vector<8x384xf32>,
    %c0_4 = arith.constant 0 : index
    %c0_5 = arith.constant 0 : index
    %c1 = arith.constant 1 : index
    %3 = vector.load %arg1[%c0_4, %c0_5, %c1] : memref<1x8x512xf32, #tpu.memory_space<vmem>>, vector<1x8x384xf32>
    %4 = vector.shape_cast %3 : vector<1x8x384xf32> to vector<8x384xf32>
    %c8 = arith.constant 8 : index
    %c0_6 = arith.constant 0 : index
    %5 = vector.load %arg7[%c8, %c0_6] : memref<72x384xf32, #tpu.memory_space<vmem>>, vector<8x384xf32>
    tpu.vector_store %arg7[%c8, %c0_6], %4 {strides = array<i32>} : memref<72x384xf32, #tpu.memory_space<vmem>>, vector<8x384xf32>,
    %c0_7 = arith.constant 0 : index
    %c0_8 = arith.constant 0 : index
    %c2 = arith.constant 2 : index
    %6 = vector.load %arg1[%c0_7, %c0_8, %c2] : memref<1x8x512xf32, #tpu.memory_space<vmem>>, vector<1x8x384xf32>
    %7 = vector.shape_cast %6 : vector<1x8x384xf32> to vector<8x384xf32>
    %c16 = arith.constant 16 : index
    %c0_9 = arith.constant 0 : index
    %8 = vector.load %arg7[%c16, %c0_9] : memref<72x384xf32, #tpu.memory_space<vmem>>, vector<8x384xf32>
    tpu.vector_store %arg7[%c16, %c0_9], %7 {strides = array<i32>} : memref<72x384xf32, #tpu.memory_space<vmem>>, vector<8x384xf32>,
    %c0_10 = arith.constant 0 : index
    %c0_11 = arith.constant 0 : index
    %c18 = arith.constant 18 : index
    %9 = vector.load %arg1[%c0_10, %c0_11, %c18] : memref<1x8x512xf32, #tpu.memory_space<vmem>>, vector<1x8x384xf32>
    %10 = vector.shape_cast %9 : vector<1x8x384xf32> to vector<8x384xf32>
    %c24 = arith.constant 24 : index
    %c0_12 = arith.constant 0 : index
    %11 = vector.load %arg7[%c24, %c0_12] : memref<72x384xf32, #tpu.memory_space<vmem>>, vector<8x384xf32>
    tpu.vector_store %arg7[%c24, %c0_12], %10 {strides = array<i32>} : memref<72x384xf32, #tpu.memory_space<vmem>>, vector<8x384xf32>,
    %c0_13 = arith.constant 0 : index
    %c0_14 = arith.constant 0 : index
    %c19 = arith.constant 19 : index
    %12 = vector.load %arg1[%c0_13, %c0_14, %c19] : memref<1x8x512xf32, #tpu.memory_space<vmem>>, vector<1x8x384xf32>
    %13 = vector.shape_cast %12 : vector<1x8x384xf32> to vector<8x384xf32>
    %c32 = arith.constant 32 : index
    %c0_15 = arith.constant 0 : index
    %14 = vector.load %arg7[%c32, %c0_15] : memref<72x384xf32, #tpu.memory_space<vmem>>, vector<8x384xf32>
    tpu.vector_store %arg7[%c32, %c0_15], %13 {strides = array<i32>} : memref<72x384xf32, #tpu.memory_space<vmem>>, vector<8x384xf32>,
    %c0_16 = arith.constant 0 : index
    %c0_17 = arith.constant 0 : index
    %c20 = arith.constant 20 : index
    %15 = vector.load %arg1[%c0_16, %c0_17, %c20] : memref<1x8x512xf32, #tpu.memory_space<vmem>>, vector<1x8x384xf32>
    %16 = vector.shape_cast %15 : vector<1x8x384xf32> to vector<8x384xf32>
    %c40 = arith.constant 40 : index
    %c0_18 = arith.constant 0 : index
    %17 = vector.load %arg7[%c40, %c0_18] : memref<72x384xf32, #tpu.memory_space<vmem>>, vector<8x384xf32>
    tpu.vector_store %arg7[%c40, %c0_18], %16 {strides = array<i32>} : memref<72x384xf32, #tpu.memory_space<vmem>>, vector<8x384xf32>,
    %c0_19 = arith.constant 0 : index
    %c0_20 = arith.constant 0 : index
    %c36 = arith.constant 36 : index
    %18 = vector.load %arg1[%c0_19, %c0_20, %c36] : memref<1x8x512xf32, #tpu.memory_space<vmem>>, vector<1x8x384xf32>
    %19 = vector.shape_cast %18 : vector<1x8x384xf32> to vector<8x384xf32>
    %c48 = arith.constant 48 : index
    %c0_21 = arith.constant 0 : index
    %20 = vector.load %arg7[%c48, %c0_21] : memref<72x384xf32, #tpu.memory_space<vmem>>, vector<8x384xf32>
    tpu.vector_store %arg7[%c48, %c0_21], %19 {strides = array<i32>} : memref<72x384xf32, #tpu.memory_space<vmem>>, vector<8x384xf32>,
    %c0_22 = arith.constant 0 : index
    %c0_23 = arith.constant 0 : index
    %c37 = arith.constant 37 : index
    %21 = vector.load %arg1[%c0_22, %c0_23, %c37] : memref<1x8x512xf32, #tpu.memory_space<vmem>>, vector<1x8x384xf32>
    %22 = vector.shape_cast %21 : vector<1x8x384xf32> to vector<8x384xf32>
    %c56 = arith.constant 56 : index
    %c0_24 = arith.constant 0 : index
    %23 = vector.load %arg7[%c56, %c0_24] : memref<72x384xf32, #tpu.memory_space<vmem>>, vector<8x384xf32>
    tpu.vector_store %arg7[%c56, %c0_24], %22 {strides = array<i32>} : memref<72x384xf32, #tpu.memory_space<vmem>>, vector<8x384xf32>,
    %c0_25 = arith.constant 0 : index
    %c0_26 = arith.constant 0 : index
    %c38 = arith.constant 38 : index
    %24 = vector.load %arg1[%c0_25, %c0_26, %c38] : memref<1x8x512xf32, #tpu.memory_space<vmem>>, vector<1x8x384xf32>
    %25 = vector.shape_cast %24 : vector<1x8x384xf32> to vector<8x384xf32>
    %c64 = arith.constant 64 : index
    %c0_27 = arith.constant 0 : index
    %26 = vector.load %arg7[%c64, %c0_27] : memref<72x384xf32, #tpu.memory_space<vmem>>, vector<8x384xf32>
    tpu.vector_store %arg7[%c64, %c0_27], %25 {strides = array<i32>} : memref<72x384xf32, #tpu.memory_space<vmem>>, vector<8x384xf32>,
    %c0_28 = arith.constant 0 : index
    %c0_29 = arith.constant 0 : index
    %27 = vector.load %arg2[%c0_28, %c0_29] : memref<8x72xf32, #tpu.memory_space<vmem>>, vector<8x72xf32>
    %c0_30 = arith.constant 0 : index
    %c0_31 = arith.constant 0 : index
    %28 = vector.load %arg7[%c0_30, %c0_31] : memref<72x384xf32, #tpu.memory_space<vmem>>, vector<72x384xf32>
    %cst = arith.constant dense<0.000000e+00> : vector<8x384xf32>
    %29 = tpu.matmul %27, %28, %cst {dimension_numbers = #tpu.dot_dimension_numbers<[1], [0], [0], [1], [0, 0, 1, 1], [], []>} : vector<8x72xf32>, vector<72x384xf32>, vector<8x384xf32> -> vector<8x384xf32>
    %c0_32 = arith.constant 0 : index
    %c0_33 = arith.constant 0 : index
    %c0_34 = arith.constant 0 : index
    %30 = vector.load %arg4[%c0_32, %c0_33, %c0_34] : memref<1x8x384xf32, #tpu.memory_space<vmem>>, vector<1x8x384xf32>
    %31 = vector.shape_cast %30 : vector<1x8x384xf32> to vector<8x384xf32>
    %32 = vector.shape_cast %29 : vector<8x384xf32> to vector<1x8x384xf32>
    tpu.vector_store %arg4[%c0_32, %c0_33, %c0_34], %32 {strides = array<i32>} : memref<1x8x384xf32, #tpu.memory_space<vmem>>, vector<1x8x384xf32>,
    %c0_35 = arith.constant 0 : index
    %c0_36 = arith.constant 0 : index
    %33 = vector.load %arg3[%c0_35, %c0_36] : memref<1x384xf32, #tpu.memory_space<vmem>>, vector<1x384xf32>
    %34 = vector.broadcast %33 : vector<1x384xf32> to vector<8x384xf32>
    %35 = arith.mulf %29, %34 : vector<8x384xf32>
    %cst_37 = arith.constant dense<0.000000e+00> : vector<8xf32>
    %36 = vector.multi_reduction <add>, %35, %cst_37 [1] : vector<8x384xf32> to vector<8xf32>
    %37 = vector.shape_cast %36 : vector<8xf32> to vector<8x1xf32>
    %c0_38 = arith.constant 0 : index
    %c0_39 = arith.constant 0 : index
    %c0_40 = arith.constant 0 : index
    %38 = vector.load %arg5[%c0_38, %c0_39, %c0_40] : memref<1x8x1xf32, #tpu.memory_space<vmem>>, vector<1x8x1xf32>
    %39 = vector.shape_cast %38 : vector<1x8x1xf32> to vector<8x1xf32>
    %40 = vector.shape_cast %37 : vector<8x1xf32> to vector<1x8x1xf32>
    tpu.vector_store %arg5[%c0_38, %c0_39, %c0_40], %40 {strides = array<i32>} : memref<1x8x1xf32, #tpu.memory_space<vmem>>, vector<1x8x1xf32>,
    %41 = arith.mulf %35, %29 : vector<8x384xf32>
    %cst_41 = arith.constant dense<0.000000e+00> : vector<8xf32>
    %42 = vector.multi_reduction <add>, %41, %cst_41 [1] : vector<8x384xf32> to vector<8xf32>
    %43 = vector.shape_cast %42 : vector<8xf32> to vector<8x1xf32>
    %c0_42 = arith.constant 0 : index
    %c0_43 = arith.constant 0 : index
    %c0_44 = arith.constant 0 : index
    %44 = vector.load %arg6[%c0_42, %c0_43, %c0_44] : memref<1x8x1xf32, #tpu.memory_space<vmem>>, vector<1x8x1xf32>
    %45 = vector.shape_cast %44 : vector<1x8x1xf32> to vector<8x1xf32>
    %46 = vector.shape_cast %43 : vector<8x1xf32> to vector<1x8x1xf32>
    tpu.vector_store %arg6[%c0_42, %c0_43, %c0_44], %46 {strides = array<i32>} : memref<1x8x1xf32, #tpu.memory_space<vmem>>, vector<1x8x1xf32>,
    return
  }
  func.func @transform_0(%arg0: i32) -> (i32, i32, i32) {
    %c0_i32 = arith.constant 0 : i32
    %c0_i32_0 = arith.constant 0 : i32
    %c0_i32_1 = arith.constant 0 : i32
    return %arg0, %c0_i32, %c0_i32_0 : i32, i32, i32
  }
  func.func @transform_1(%arg0: i32) -> (i32, i32) {
    %c0_i32 = arith.constant 0 : i32
    %c0_i32_0 = arith.constant 0 : i32
    %c0_i32_1 = arith.constant 0 : i32
    return %c0_i32, %c0_i32_0 : i32, i32
  }
  func.func @transform_2(%arg0: i32) -> (i32, i32) {
    %c0_i32 = arith.constant 0 : i32
    %c0_i32_0 = arith.constant 0 : i32
    %c0_i32_1 = arith.constant 0 : i32
    return %c0_i32, %c0_i32_0 : i32, i32
  }
  func.func @transform_3(%arg0: i32) -> (i32, i32, i32) {
    %c0_i32 = arith.constant 0 : i32
    %c0_i32_0 = arith.constant 0 : i32
    %c0_i32_1 = arith.constant 0 : i32
    return %arg0, %c0_i32, %c0_i32_0 : i32, i32, i32
  }
  func.func @transform_4(%arg0: i32) -> (i32, i32, i32) {
    %c0_i32 = arith.constant 0 : i32
    %c0_i32_0 = arith.constant 0 : i32
    %c0_i32_1 = arith.constant 0 : i32
    return %arg0, %c0_i32, %c0_i32_0 : i32, i32, i32
  }
  func.func @transform_5(%arg0: i32) -> (i32, i32, i32) {
    %c0_i32 = arith.constant 0 : i32
    %c0_i32_0 = arith.constant 0 : i32
    %c0_i32_1 = arith.constant 0 : i32
    return %arg0, %c0_i32, %c0_i32_0 : i32, i32, i32
  }
}

</mosaic_0001>

<bundles_post_ra>
// kernel: rectify_block.3
= control target key start
LH: loop header
LB: loop body
LE: loop exit
PB: predicated region body
PF: predicated region fallthrough
CT: control target
= control target key end

     0   :  { %s299_s12 = smov 0   ;;  %s322_s0 = inlined_call_operand.vmem [shape: f32[2,8,384], index: 0, kind: input, shape index: {}]   ;;  %s323_s1 = inlined_call_operand.vmem [shape: f32[8,1], index: 1, kind: input, shape index: {}]   ;;  %s324_s2 = inlined_call_operand.vmem [shape: f32[8,1], index: 2, kind: input, shape index: {}]   ;;  %s325_s3 = inlined_call_operand.vmem [shape: f32[2,8,384], index: 3, kind: output, shape index: {}]  }
   0x1 LB: > { %s250_s13 = sadd.s32 4294967295, %s276_s12   ;;  %p254_p0 = scmp.ge.s32.totalorder %s276_s12, 1  ;;  %s276_s12 = sphi %s299_s12, %s13_s12  }
   0x2   : > { %p137_p1 = scmp.lt.s32.totalorder %s276_s12, 3 }
   0x4   : > { %p138_p2 = pnand %p254_p0, %p137_p1 }
   0x5   : > { %p161_p3 = scmp.lt.s32.totalorder (!%p138_p2), %s250_s13, 1 }
   0x6   : > { %141 = sbr.rel (%p138_p2) target bundleno = 141 (0x8d), region = 32 }
   0xb   : > { %v174_v0 = vld [vmem:[%s323_s1] sm:$0xff]  ;;  %v278_v1 = vmov 0   ;;  %s327_s13 = smov (!%p161_p3, %s250_s13), 1 }
   0xc   : > { %269 = vset.pattern.permute.xlu0 %v278_v1  ;;  %v183_v2 = vld [vmem:[%s324_s2] sm:$0xff]  ;;  %s259_s18 = smul.u32 24, %s327_s13 }
   0xd   : > { %177 = vperm.xlu0 %269, %v174_v0  }
   0xe   : > { %s165_s21 = scalar_lea.vmem %s322_s0, %s259_s18  ;;  %s170_s24 = scalar_lea.vmem %s325_s3, %s259_s18 }
   0xf   : > { %v171_v4 = vld [vmem:[%s165_s21] sm:$0xff]  ;;  %v172_v5 = vld [vmem:[%s165_s21 + $0x8] sm:$0xff]  ;;  %v173_v6 = vld [vmem:[%s165_s21 + $0x10] sm:$0xff] }
  0x15   : > { %186 = vperm.xlu0 %269, %v183_v2  }
  0x7f   : > { %v178_v3 = vpop.permute.xlu0 %177 }
  0x80   : > { %v180_v7 = vmul.f32 %v178_v3, %v171_v4  ;;  %v181_v8 = vmul.f32 %v178_v3, %v172_v5  ;;  %v182_v9 = vmul.f32 %v178_v3, %v173_v6 }
  0x87   : > { %v187_v10 = vpop.permute.xlu0 %186 }
  0x88   : > { %v189_v11 = vadd.f32 %v187_v10, %v180_v7  ;;  %v190_v12 = vadd.f32 %v187_v10, %v181_v8  ;;  %v191_v13 = vadd.f32 %v187_v10, %v182_v9 }
  0x8a   : > { %192 = vst [vmem:[%s170_s24] sm:$0xff] %v189_v11 }
  0x8b   : > { %193 = vst [vmem:[%s170_s24 + $0x8] sm:$0xff] %v190_v12 }
  0x8c   : > { %194 = vst [vmem:[%s170_s24 + $0x10] sm:$0xff] %v191_v13 }
  0x8d PF: > { %s13_s12 = sadd.s32 1, %s276_s12  }
  0x8e   : > { %p10_p4 = scmp.ge.s32.totalorder %s13_s12, 4  }
  0x90   :  { %12 = sbr.rel (!%p10_p4) target bundleno = 1 (0x1), region = 62 }

// kernel: rectify_block.2
= control target key start
LH: loop header
LB: loop body
LE: loop exit
PB: predicated region body
PF: predicated region fallthrough
CT: control target
= control target key end

     0   :  { %s856_s18 = smov 0   ;;  %s937_s0 = inlined_call_operand.vmem [shape: f32[2,8,512], index: 0, kind: input, shape index: {}]   ;;  %s938_s1 = inlined_call_operand.vmem [shape: f32[8,72], index: 1, kind: input, shape index: {}]   ;;  %s939_s2 = inlined_call_operand.vmem [shape: f32[1,384], index: 2, kind: input, shape index: {}]   ;;  %s940_s3 = inlined_call_operand.vmem [shape: f32[2,8,384], index: 3, kind: output, shape index: {0}]   ;;  %s941_s4 = inlined_call_operand.vmem [shape: f32[2,8,1], index: 4, kind: output, shape index: {1}]   ;;  %s942_s5 = inlined_call_operand.vmem [shape: f32[2,8,1], index: 5, kind: output, shape index: {2}]  }
   0x1 LB: > { %s697_s19 = sadd.s32 4294967295, %s816_s18   ;;  %p701_p0 = scmp.ge.s32.totalorder %s816_s18, 1  ;;  %s816_s18 = sphi %s856_s18, %s16_s18  }
   0x2   : > { %p192_p1 = scmp.lt.s32.totalorder %s816_s18, 3 }
   0x4   : > { %p193_p2 = pnand %p701_p0, %p192_p1 }
   0x5   : > { %p228_p3 = scmp.lt.s32.totalorder (!%p193_p2), %s697_s19, 1  ;;  %s818_s24 = smov (!%p193_p2), 90  }
   0x6   : > { %196 = sbr.rel (%p193_p2) target bundleno = 429 (0x1ad), region = 32  ;;  %s819_s25 = smov (!%p193_p2), 92  }
   0x7   : > { %s820_s26 = smov (!%p193_p2), 108   ;;  %s821_s27 = smov (!%p193_p2), 91  }
   0x8   : > { %s822_s28 = smov (!%p193_p2), 109   ;;  %s823_s29 = smov (!%p193_p2), 110  }
   0x9   : > { %s824_s30 = smov (!%p193_p2), 126   ;;  %s825_s6 = smov (!%p193_p2), 127  }
   0xb   : > { %s944_s19 = smov (!%p228_p3, %s697_s19), 1  ;;  %vm450_vm0 = vcmask 736256   ;;  %vm424_vm1 = vcmask 744448   ;;  %vm398_vm2 = vcmask 752640   ;;  %vm372_vm3 = vcmask 883712  }
   0xc   : > { %s712_s20 = sshll.u32 %s944_s19, 5  ;;  %vm346_vm4 = vcmask 891904   ;;  %vm320_vm5 = vcmask 900096   ;;  %vm294_vm6 = vcmask 1031168   ;;  %vm268_vm7 = vcmask 1039360   ;;  %s713_s9 = smul.u32 24, %s944_s19 }
   0xd   : > { %s232_s23 = scalar_lea.vmem %s937_s0, %s712_s20  ;;  %vm488_vm8 = vcmask 588800   ;;  %s705_s15 = sshll.u32 %s944_s19, 3  ;;  %vm570_vm9 = vcmask 7168  }
   0xe   : > { %v870_v0 = vld [vmem:[%s232_s23 + $0x10] sm:$0xff]  ;;  %v437_v1 = vld [vmem:[%s232_s23 + $0x18] sm:$0xff]  ;;  %v873_v3 = vld [vmem:[%s232_s23] sm:$0xff]  ;;  %s237_s14 = scalar_lea.vmem %s940_s3, %s713_s9  ;;  %s241_s20 = scalar_lea.vmem %s941_s4, %s705_s15 }
   0xf   : > { %v730_v2 = vpack.i.bf16 %v437_v1, %v870_v0  ;;  %v875_v4 = vld [vmem:[%s232_s23 + $0x8] sm:$0xff]  ;;  %s245_s23 = scalar_lea.vmem %s942_s5, %s705_s15 }
  0x10   : > { %v745_v5 = vpack.i.bf16 %v875_v4, %v873_v3 }
  0x11   : > { %731 = vrot.lane.b32.xlu0 %v730_v2, %s818_s24  ;;  %741 = vrot.lane.b32.xlu1 %v730_v2, %s819_s25 }
  0x12   : > { %751 = vrot.lane.b32.xlu2 %v730_v2, %s820_s26 }
  0x19   : > { %736 = vrot.lane.b32.xlu0 %v730_v2, %s821_s27  ;;  %746 = vrot.lane.b32.xlu1 %v745_v5, %s818_s24 }
  0x1a   : > { %756 = vrot.lane.b32.xlu2 %v745_v5, %s821_s27 }
  0x21   : > { %766 = vrot.lane.b32.xlu1 %v745_v5, %s819_s25  ;;  %761 = vrot.lane.b32.xlu0 %v730_v2, %s822_s28 }
  0x22   : > { %771 = vrot.lane.b32.xlu2 %v730_v2, %s823_s29 }
  0x29   : > { %776 = vrot.lane.b32.xlu0 %v745_v5, %s820_s26  ;;  %781 = vrot.lane.b32.xlu1 %v730_v2, %s824_s30 }
  0x2a   : > { %786 = vrot.lane.b32.xlu2 %v745_v5, %s822_s28 }
  0x31   : > { %796 = vrot.lane.b32.xlu1 %v745_v5, %s823_s29  ;;  %791 = vrot.lane.b32.xlu0 %v730_v2, %s825_s6 }
  0x32   : > { %801 = vrot.lane.b32.xlu2 %v745_v5, %s824_s30 }
  0x39   : > { %806 = vrot.lane.b32.xlu0 %v745_v5, %s825_s6 }
  0x6c   : > { %v879_v6 = vpop.permute.xlu2 %751 }
  0x6d   : > { %v754_v23 = vunpack.i.h.bf16 %v879_v6  ;;  %v753_v24 = vunpack.i.l.bf16 %v879_v6 }
  0x6f   : > { %v375_v34 = vsel %vm372_vm3, %v753_v24, %v754_v23 }
  0x74   : > { %v757_v11 = vpop.permute.xlu2 %756 }
  0x75   : > { %v759_v15 = vunpack.i.h.bf16 %v757_v11  ;;  %v758_v16 = vunpack.i.l.bf16 %v757_v11 }
  0x77   : > { %v425_v29 = vsel %vm424_vm1, %v758_v16, %v759_v15 }
  0x7c   : > { %v884_v25 = vpop.permute.xlu2 %771 }
  0x7d   : > { %v774_v32 = vunpack.i.h.bf16 %v884_v25  ;;  %v773_v33 = vunpack.i.l.bf16 %v884_v25 }
  0x7f   : > { %v323_v44 = vsel %vm320_vm5, %v773_v33, %v774_v32 }
  0x83   : > { %v732_v7 = vpop.permute.xlu0 %731  ;;  %v742_v8 = vpop.permute.xlu1 %741 }
  0x84   : > { %v734_v9 = vunpack.i.h.bf16 %v732_v7  ;;  %v733_v10 = vunpack.i.l.bf16 %v732_v7  ;;  %v744_v13 = vunpack.i.h.bf16 %v742_v8  ;;  %v743_v14 = vunpack.i.l.bf16 %v742_v8  ;;  %v787_v45 = vpop.permute.xlu2 %786 }
  0x85   : > { %v788_v46 = vunpack.i.l.bf16 %v787_v45  ;;  %v789_v47 = vunpack.i.h.bf16 %v787_v45 }
  0x86   : > { %v453_v12 = vsel %vm450_vm0, %v733_v10, %v734_v9  ;;  %v401_v31 = vsel %vm398_vm2, %v743_v14, %v744_v13 }
  0x87   : > { %539 = vmatpush.msra.mxu2 %v453_v12  ;;  %v347_v57 = vsel %vm346_vm4, %v788_v46, %v789_v47 }
  0x8b   : > { %v737_v17 = vpop.permute.xlu0 %736  ;;  %v747_v18 = vpop.permute.xlu1 %746 }
  0x8c   : > { %v739_v19 = vunpack.i.h.bf16 %v737_v17  ;;  %v738_v20 = vunpack.i.l.bf16 %v737_v17  ;;  %v749_v21 = vunpack.i.h.bf16 %v747_v18  ;;  %v748_v22 = vunpack.i.l.bf16 %v747_v18  ;;  %v802_v58 = vpop.permute.xlu2 %801 }
  0x8d   : > { %v804_v60 = vunpack.i.h.bf16 %v802_v58  ;;  %v803_v61 = vunpack.i.l.bf16 %v802_v58 }
  0x8e   : > { %v452_v26 = vsel %vm450_vm0, %v749_v21, %v733_v10  ;;  %v427_v27 = vsel %vm424_vm1, %v738_v20, %v739_v19  ;;  %v451_v28 = vsel %vm450_vm0, %v748_v22, %v749_v21  ;;  %v426_v30 = vsel %vm424_vm1, %v759_v15, %v738_v20  ;;  %v460_v10 = vld [vmem:[%s938_s1] sm:$0xff] }
  0x8f   : > { %519 = vmatpush.msra.mxu1 %v452_v26  ;;  %540 = vmatpush.msra.mxu2 %v427_v27  ;;  %v295_v11 = vsel %vm294_vm6, %v803_v61, %v804_v60 }
  0x90   : > { %499 = vmatpush.msra.mxu0 %v451_v28 }
  0x91   : > { %520 = vmatpush.msra.mxu1 %v426_v30  ;;  %541 = vmatpush.msra.mxu2 %v401_v31 }
  0x92   : > { %500 = vmatpush.msra.mxu0 %v425_v29 }
  0x93   : > { %v767_v35 = vpop.permute.xlu1 %766  ;;  %542 = vmatpush.msra.mxu2 %v375_v34  ;;  %v762_v36 = vpop.permute.xlu0 %761 }
  0x94   : > { %v769_v37 = vunpack.i.h.bf16 %v767_v35  ;;  %v768_v38 = vunpack.i.l.bf16 %v767_v35  ;;  %v764_v39 = vunpack.i.h.bf16 %v762_v36  ;;  %v763_v40 = vunpack.i.l.bf16 %v762_v36 }
  0x96   : > { %v400_v41 = vsel %vm398_vm2, %v769_v37, %v743_v14  ;;  %v349_v42 = vsel %vm346_vm4, %v763_v40, %v764_v39  ;;  %v399_v43 = vsel %vm398_vm2, %v768_v38, %v769_v37  ;;  %v348_v59 = vsel %vm346_vm4, %v789_v47, %v763_v40 }
  0x97   : > { %521 = vmatpush.msra.mxu1 %v400_v41  ;;  %543 = vmatpush.msra.mxu2 %v349_v42 }
  0x98   : > { %501 = vmatpush.msra.mxu0 %v399_v43 }
  0x99   : > { %544 = vmatpush.msra.mxu2 %v323_v44 }
  0x9b   : > { %v777_v48 = vpop.permute.xlu0 %776  ;;  %v782_v49 = vpop.permute.xlu1 %781 }
  0x9c   : > { %v779_v50 = vunpack.i.h.bf16 %v777_v48  ;;  %v778_v51 = vunpack.i.l.bf16 %v777_v48  ;;  %v784_v52 = vunpack.i.h.bf16 %v782_v49  ;;  %v783_v53 = vunpack.i.l.bf16 %v782_v49 }
  0x9e   : > { %v373_v54 = vsel %vm372_vm3, %v778_v51, %v779_v50  ;;  %v374_v55 = vsel %vm372_vm3, %v779_v50, %v753_v24  ;;  %v297_v56 = vsel %vm294_vm6, %v783_v53, %v784_v52  ;;  %v296_v12 = vsel %vm294_vm6, %v804_v60, %v783_v53 }
  0x9f   : > { %502 = vmatpush.msra.mxu0 %v373_v54  ;;  %522 = vmatpush.msra.mxu1 %v374_v55 }
  0xa0   : > { %545 = vmatpush.msra.mxu2 %v297_v56 }
  0xa1   : > { %523 = vmatpush.msra.mxu1 %v348_v59  ;;  %503 = vmatpush.msra.mxu0 %v347_v57 }
  0xa3   : > { %v797_v62 = vpop.permute.xlu1 %796  ;;  %v792_v63 = vpop.permute.xlu0 %791 }
  0xa4   : > { %v799_v1 = vunpack.i.h.bf16 %v797_v62  ;;  %v798_v2 = vunpack.i.l.bf16 %v797_v62  ;;  %v794_v5 = vunpack.i.h.bf16 %v792_v63  ;;  %v793_v6 = vunpack.i.l.bf16 %v792_v63 }
  0xa6   : > { %v322_v7 = vsel %vm320_vm5, %v799_v1, %v773_v33  ;;  %v271_v8 = vsel %vm268_vm7, %v793_v6, %v794_v5  ;;  %v321_v9 = vsel %vm320_vm5, %v798_v2, %v799_v1 }
  0xa7   : > { %524 = vmatpush.msra.mxu1 %v322_v7  ;;  %546 = vmatpush.msra.mxu2 %v271_v8 }
  0xa8   : > { %504 = vmatpush.msra.mxu0 %v321_v9 }
  0xa9   : > { %525 = vmatpush.msra.mxu1 %v296_v12  ;;  %547 = vmatpush.msra.mxu2 %v870_v0  ;;  %v555_v0 = vld [vmem:[%s939_s2] sm:$0x7] }
  0xaa   : > { %709 = vmatmul.msk.f32.vlgmr.msra.gmra.mxu2 %vm488_vm8, %v460_v10  ;;  %505 = vmatpush.msra.mxu0 %v295_v11  ;;  %v557_v18 = vperm.slane %v555_v0, 0  ;;  %v558_v19 = vperm.slane %v555_v0, 1  ;;  %v559_v20 = vperm.slane %v555_v0, 2 }
  0xab   : > { %v807_v13 = vpop.permute.xlu0 %806 }
  0xac   : > { %v809_v14 = vunpack.i.h.bf16 %v807_v13  ;;  %v808_v15 = vunpack.i.l.bf16 %v807_v13 }
  0xae   : > { %v269_v16 = vsel %vm268_vm7, %v808_v15, %v809_v14  ;;  %v270_v17 = vsel %vm268_vm7, %v809_v14, %v793_v6 }
  0xaf   : > { %506 = vmatpush.msra.mxu0 %v269_v16  ;;  %526 = vmatpush.msra.mxu1 %v270_v17 }
  0xb1   : > { %507 = vmatpush.msra.mxu0 %v873_v3  ;;  %527 = vmatpush.msra.mxu1 %v875_v4 }
  0xb2   : > { %707 = vmatmul.msk.f32.vlgmr.msra.gmra.mxu0 %vm488_vm8, %v460_v10  ;;  %708 = vmatmul.msk.f32.vlgmr.msra.gmra.mxu1 %vm488_vm8, %v460_v10 }
 0x12d   : > { %v549_v21 = vpop.f32.mrf.mxu2 }
 0x12e   : > { %554 = vst [vmem:[%s237_s14 + $0x10] sm:$0xff] %v549_v21  ;;  %v565_v24 = vmul.f32 %v559_v20, %v549_v21 }
 0x12f   : > { %v509_v3 = vpop.f32.mrf.mxu0  ;;  %v529_v4 = vpop.f32.mrf.mxu1 }
 0x130   : > { %552 = vst [vmem:[%s237_s14] sm:$0xff] %v509_v3  ;;  %v563_v22 = vmul.f32 %v557_v18, %v509_v3  ;;  %v564_v23 = vmul.f32 %v558_v19, %v529_v4  ;;  %v574_v28 = vmul.f32 %v565_v24, %v549_v21 }
 0x131   : > { %553 = vst [vmem:[%s237_s14 + $0x8] sm:$0xff] %v529_v4 }
 0x132   : > { %v572_v25 = vmul.f32 %v563_v22, %v509_v3  ;;  %v573_v26 = vmul.f32 %v564_v23, %v529_v4  ;;  %v566_v27 = vadd.f32 %v564_v23, %v563_v22 }
 0x134   : > { %v567_v29 = vadd.f32 %v566_v27, %v565_v24  ;;  %v575_v30 = vadd.f32 %v573_v26, %v572_v25 }
 0x136   : > { %568 = vadd.xlane.f32.xlu1 %v567_v29  ;;  %v576_v31 = vadd.f32 %v575_v30, %v574_v28 }
 0x138   : > { %577 = vadd.xlane.f32.xlu2 %v576_v31 }
 0x1a9   : > { %v569_v32 = vpop.xlane.xlu1 %568 }
 0x1aa   : > { %571 = vst.msk [vmem:[%s241_s20] sm:$0xff] %vm570_vm9, %v569_v32 }
 0x1ab   : > { %v578_v33 = vpop.xlane.xlu2 %577 }
 0x1ac   : > { %579 = vst.msk [vmem:[%s245_s23] sm:$0xff] %vm570_vm9, %v578_v33 }
 0x1ad PF: > { %s16_s18 = sadd.s32 1, %s816_s18  }
 0x1ae   : > { %p13_p4 = scmp.ge.s32.totalorder %s16_s18, 4  }
 0x1b0   :  { %15 = sbr.rel (!%p13_p4) target bundleno = 1 (0x1), region = 86 }

</bundles_post_ra>
